<compile_context>
chip_gen: v6e
topology: v6e:2x2x1
jax: 0.10.0
libtpu: 0.0.40
codegen_flags: <defaults>
</compile_context>

<pallas_src>
import jax
import jax.numpy as jnp
from jax.experimental import pallas as pl
from jax.experimental.pallas import tpu as pltpu


def embed_kernel(idx_ref, table_ref, o_ref):
    # idx_ref   : VMEM (R, 1)  int32  -- token ids for this row block
    # table_ref : VMEM (V, D)         -- full embedding table (resident)
    # o_ref     : VMEM (R, D)
    rows = o_ref.shape[0]
    vocab = table_ref.shape[0]

    idx = idx_ref[...]                                             # (R, 1)
    iota = jax.lax.broadcasted_iota(jnp.int32, (rows, vocab), 1)   # (R, V)
    one_hot = (idx == iota).astype(table_ref.dtype)                # (R, V)

    # Gather on the MXU: exact (0/1 weights, single nonzero per row).
    o_ref[...] = jnp.dot(
        one_hot, table_ref[...], preferred_element_type=jnp.float32
    ).astype(o_ref.dtype)


def embedding_lookup(indices, table, *, rows_per_block=256):
    B, S = indices.shape
    V, D = table.shape
    assert D % 128 == 0, "keep n_dim a multiple of 128 for lane-dense stores"

    # Resident-table budget check (see TODO above for the large-vocab path).
    table_bytes = V * D * jnp.dtype(table.dtype).itemsize
    assert table_bytes <= 12 * 1024 * 1024, (
        "embedding table too large to keep resident in VMEM; use the "
        "DMA row-gather path instead")

    N = B * S
    num_blocks = pl.cdiv(N, rows_per_block)
    N_pad = num_blocks * rows_per_block

    flat_idx = indices.reshape(N).astype(jnp.int32)
    if N_pad != N:
        # Pad with id 0 (always valid); padded rows are sliced off below.
        flat_idx = jnp.pad(flat_idx, (0, N_pad - N))
    idx2d = flat_idx.reshape(N_pad, 1)

    out_flat = pl.pallas_call(
        embed_kernel,
        out_shape=jax.ShapeDtypeStruct((N_pad, D), table.dtype),
        grid_spec=pltpu.PrefetchScalarGridSpec(
            num_scalar_prefetch=0,
            grid=(num_blocks,),
            in_specs=[
                # per-step column of token ids
                pl.BlockSpec((rows_per_block, 1), lambda i: (i, 0)),
                # full table, resident across all grid steps
                pl.BlockSpec((V, D), lambda i: (0, 0)),
            ],
            out_specs=pl.BlockSpec((rows_per_block, D), lambda i: (i, 0)),
        ),
        compiler_params=pltpu.CompilerParams(
            # No carried state across row blocks -> parallel (2 TCs on v7x).
            dimension_semantics=("parallel",),
            # Raise scoped VMEM so the resident table + double-buffered
            # output slabs fit even under v5e's 16 MiB default.
            vmem_limit_bytes=32 * 1024 * 1024,
        ),
    )(idx2d, table)

    return out_flat[:N].reshape(B, S, D)


if __name__ == "__main__":
    # small deterministic setup consistent with Embedding(n_vocab, n_dim)
    n_vocab, n_dim = 64, 128
    batch, seq = 2, 8

    key = jax.random.PRNGKey(0)
    k_w, k_idx = jax.random.split(key)

    # nn.Embedding default init: N(0, 1)
    table = jax.random.normal(k_w, (n_vocab, n_dim), dtype=jnp.float32)
    indices = jax.random.randint(k_idx, (batch, seq), 0, n_vocab, dtype=jnp.int32)

    out = embedding_lookup(indices, table)
    out = jax.block_until_ready(out)

    # reference check
    ref = jnp.take(table, indices, axis=0)
    assert out.shape == (batch, seq, n_dim)
    assert jnp.allclose(out, ref), "mismatch vs reference gather"

    print("KERNEL_OK")
</pallas_src>

<mosaic_0001>
module attributes {stable_mosaic.version = 11 : i64} {
  func.func @embed_kernel(%arg0: i32, %arg1: memref<256x1xi32, #tpu.memory_space<vmem>>, %arg2: memref<64x128xf32, #tpu.memory_space<vmem>>, %arg3: memref<256x128xf32, #tpu.memory_space<vmem>>) attributes {dimension_semantics = [#tpu.dimension_semantics<parallel>], iteration_bounds = array<i64: 1>, scalar_prefetch = 0 : i64, scratch_operands = 0 : i64, tpu.core_type = #tpu.core_type<tc>, window_params = [{transform_indices = @transform_0, window_bounds = array<i64: 256, 1>}, {pipeline_mode = #tpu.pipeline_mode<synchronous>, transform_indices = @transform_1, window_bounds = array<i64: 64, 128>}, {transform_indices = @transform_2, window_bounds = array<i64: 256, 128>}]} {
    %c0 = arith.constant 0 : index
    %c0_0 = arith.constant 0 : index
    %0 = vector.load %arg1[%c0, %c0_0] : memref<256x1xi32, #tpu.memory_space<vmem>>, vector<256x1xi32>
    %1 = tpu.iota {dimensions = array<i32: 1>} : vector<256x64xi32>
    %2 = vector.broadcast %0 : vector<256x1xi32> to vector<256x64xi32>
    %3 = arith.cmpi eq, %2, %1 : vector<256x64xi32>
    %4 = arith.extui %3 : vector<256x64xi1> to vector<256x64xi32>
    %5 = arith.sitofp %4 : vector<256x64xi32> to vector<256x64xf32>
    %c0_1 = arith.constant 0 : index
    %c0_2 = arith.constant 0 : index
    %6 = vector.load %arg2[%c0_1, %c0_2] : memref<64x128xf32, #tpu.memory_space<vmem>>, vector<64x128xf32>
    %cst = arith.constant dense<0.000000e+00> : vector<256x128xf32>
    %7 = tpu.matmul %5, %6, %cst {dimension_numbers = #tpu.dot_dimension_numbers<[1], [0], [0], [1], [0, 0, 1, 1], [], []>} : vector<256x64xf32>, vector<64x128xf32>, vector<256x128xf32> -> vector<256x128xf32>
    %c0_3 = arith.constant 0 : index
    %c0_4 = arith.constant 0 : index
    %8 = vector.load %arg3[%c0_3, %c0_4] : memref<256x128xf32, #tpu.memory_space<vmem>>, vector<256x128xf32>
    tpu.vector_store %arg3[%c0_3, %c0_4], %7 {strides = array<i32>} : memref<256x128xf32, #tpu.memory_space<vmem>>, vector<256x128xf32>,
    return
  }
  func.func @transform_0(%arg0: i32) -> (i32, i32) {
    %c0_i32 = arith.constant 0 : i32
    %c0_i32_0 = arith.constant 0 : i32
    return %arg0, %c0_i32 : i32, i32
  }
  func.func @transform_1(%arg0: i32) -> (i32, i32) {
    %c0_i32 = arith.constant 0 : i32
    %c0_i32_0 = arith.constant 0 : i32
    %c0_i32_1 = arith.constant 0 : i32
    return %c0_i32, %c0_i32_0 : i32, i32
  }
  func.func @transform_2(%arg0: i32) -> (i32, i32) {
    %c0_i32 = arith.constant 0 : i32
    %c0_i32_0 = arith.constant 0 : i32
    return %arg0, %c0_i32 : i32, i32
  }
}

</mosaic_0001>

<bundles_post_ra>
// kernel: tpu_custom_call.1
= control target key start
LH: loop header
LB: loop body
LE: loop exit
PB: predicated region body
PF: predicated region fallthrough
CT: control target
= control target key end

     0   :  { %v829_v2 = vmov 0   ;;  %s1070_s0 = inlined_call_operand.vmem [shape: s32[256,1], index: 0, kind: input, shape index: {}]   ;;  %s1071_s1 = inlined_call_operand.vmem [shape: f32[64,128], index: 1, kind: input, shape index: {}]   ;;  %s1072_s2 = inlined_call_operand.hbm [shape: f32[256,128], index: 2, kind: output, shape index: {}]  }
   0x1   :  { %v13_v0 = vld [vmem:[%s1070_s0 + $0x8] sm:$0xff]  ;;  %v12_v1 = vld [vmem:[%s1070_s0] sm:$0xff]  ;;  %806 = vset.pattern.permute.xlu1 %v829_v2  ;;  %805 = vset.pattern.permute.xlu0 %v829_v2  ;;  %v30_v5 = vld [vmem:[%s1070_s0 + $0x90] sm:$0xff] }
   0x2   :  { %50 = vperm.xlu1 %806, %v13_v0   ;;  %47 = vperm.xlu0 %805, %v12_v1   ;;  %v29_v3 = vld [vmem:[%s1070_s0 + $0x88] sm:$0xff]  ;;  %v28_v4 = vld [vmem:[%s1070_s0 + $0x80] sm:$0xff]  ;;  %v14_v6 = vld [vmem:[%s1070_s0 + $0x10] sm:$0xff] }
   0x3   :  { %v245_v7 = vld [vmem:[%s1071_s1 + $0x38] sm:$0xff]  ;;  %v244_v10 = vld [vmem:[%s1071_s1 + $0x30] sm:$0xff]  ;;  %v243_v11 = vld [vmem:[%s1071_s1 + $0x28] sm:$0xff] }
   0x4   :  { %v31_v8 = vld [vmem:[%s1070_s0 + $0x98] sm:$0xff]  ;;  %720 = vmatprep.subr.mxu0 %v245_v7  ;;  %784 = vmatprep.subr.mxu1 %v245_v7 }
   0x5   :  { %v15_v9 = vld [vmem:[%s1070_s0 + $0x18] sm:$0xff]  ;;  %721 = vmatpush3.msra.mxu0 %v245_v7  ;;  %792 = vmatpush3.msra.mxu1 %v245_v7 }
   0x6   :  { %98 = vperm.xlu1 %806, %v29_v3   ;;  %95 = vperm.xlu0 %805, %v28_v4  }
   0x7   :  { %722 = vmatprep.subr.mxu0 %v244_v10  ;;  %785 = vmatprep.subr.mxu1 %v244_v10 }
   0xa   :  { %101 = vperm.xlu1 %806, %v30_v5   ;;  %53 = vperm.xlu0 %805, %v14_v6  }
   0xb   :  { %7 = vsyncpa [#allocation3], 0  ;;  %v32_v12 = vld [vmem:[%s1070_s0 + $0xa0] sm:$0xff]  ;;  %723 = vmatpush3.msra.mxu0 %v244_v10  ;;  %793 = vmatpush3.msra.mxu1 %v244_v10  ;;  %v241_v15 = vld [vmem:[%s1071_s1 + $0x18] sm:$0xff]  ;;  %v44_v41 = vlaneseq  ;;  %vm246_vm0 = vcmask 523264   ;;  %v830_v45 = vmov 0.0  }
   0xc   :  { %v16_v13 = vld [vmem:[%s1070_s0 + $0x20] sm:$0xff]  ;;  %724 = vmatprep.subr.mxu0 %v243_v11  ;;  %786 = vmatprep.subr.mxu1 %v243_v11  ;;  %v33_v16 = vld [vmem:[%s1070_s0 + $0xa8] sm:$0xff]  ;;  %v240_v18 = vld [vmem:[%s1071_s1 + $0x10] sm:$0xff] }
   0xd   :  { %v242_v14 = vld [vmem:[%s1071_s1 + $0x20] sm:$0xff]  ;;  %725 = vmatpush3.msra.mxu0 %v243_v11  ;;  %794 = vmatpush3.msra.mxu1 %v243_v11  ;;  %v17_v17 = vld [vmem:[%s1070_s0 + $0x28] sm:$0xff]  ;;  %v34_v19 = vld [vmem:[%s1070_s0 + $0xb0] sm:$0xff]  ;;  %v969_v42 = vand.u32 127, %v44_v41 }
   0xe   :  { %104 = vperm.xlu1 %806, %v31_v8   ;;  %56 = vperm.xlu0 %805, %v15_v9   ;;  %v18_v20 = vld [vmem:[%s1070_s0 + $0x30] sm:$0xff]  ;;  %v239_v21 = vld [vmem:[%s1071_s1 + $0x8] sm:$0xff]  ;;  %v238_v22 = vld [vmem:[%s1071_s1] sm:$0xff] }
   0xf   :  { %726 = vmatprep.subr.mxu0 %v242_v14  ;;  %787 = vmatprep.subr.mxu1 %v242_v14  ;;  %v35_v23 = vld [vmem:[%s1070_s0 + $0xb8] sm:$0xff]  ;;  %v36_v25 = vld [vmem:[%s1070_s0 + $0xc0] sm:$0xff]  ;;  %v37_v27 = vld [vmem:[%s1070_s0 + $0xc8] sm:$0xff] }
  0x10   :  { %727 = vmatpush3.msra.mxu0 %v242_v14  ;;  %795 = vmatpush3.msra.mxu1 %v242_v14  ;;  %v19_v24 = vld [vmem:[%s1070_s0 + $0x38] sm:$0xff]  ;;  %v20_v26 = vld [vmem:[%s1070_s0 + $0x40] sm:$0xff]  ;;  %v21_v28 = vld [vmem:[%s1070_s0 + $0x48] sm:$0xff] }
  0x11   :  { %728 = vmatprep.subr.mxu0 %v241_v15  ;;  %788 = vmatprep.subr.mxu1 %v241_v15  ;;  %v38_v29 = vld [vmem:[%s1070_s0 + $0xd0] sm:$0xff]  ;;  %v39_v31 = vld [vmem:[%s1070_s0 + $0xd8] sm:$0xff]  ;;  %v40_v33 = vld [vmem:[%s1070_s0 + $0xe0] sm:$0xff] }
  0x12   :  { %107 = vperm.xlu1 %806, %v32_v12   ;;  %59 = vperm.xlu0 %805, %v16_v13   ;;  %v22_v30 = vld [vmem:[%s1070_s0 + $0x50] sm:$0xff]  ;;  %v23_v32 = vld [vmem:[%s1070_s0 + $0x58] sm:$0xff]  ;;  %v24_v34 = vld [vmem:[%s1070_s0 + $0x60] sm:$0xff] }
  0x13   :  { %729 = vmatpush3.msra.mxu0 %v241_v15  ;;  %796 = vmatpush3.msra.mxu1 %v241_v15  ;;  %v41_v35 = vld [vmem:[%s1070_s0 + $0xe8] sm:$0xff]  ;;  %v42_v37 = vld [vmem:[%s1070_s0 + $0xf0] sm:$0xff]  ;;  %v43_v39 = vld [vmem:[%s1070_s0 + $0xf8] sm:$0xff] }
  0x14   :  { %730 = vmatprep.subr.mxu0 %v240_v18  ;;  %789 = vmatprep.subr.mxu1 %v240_v18  ;;  %v25_v36 = vld [vmem:[%s1070_s0 + $0x68] sm:$0xff]  ;;  %v26_v38 = vld [vmem:[%s1070_s0 + $0x70] sm:$0xff]  ;;  %v27_v40 = vld [vmem:[%s1070_s0 + $0x78] sm:$0xff]  ;;  %s831_s0 = smov [#allocation2]  }
  0x15   :  { %731 = vmatpush3.msra.mxu0 %v240_v18  ;;  %797 = vmatpush3.msra.mxu1 %v240_v18  ;;  %s605_s3 = sshll.u32 %s831_s0, 4  ;;  %s606_s3 = int_to_ptr.vmem [resolvable:$true] %s605_s3 }
  0x16   :  { %110 = vperm.xlu1 %806, %v33_v16   ;;  %62 = vperm.xlu0 %805, %v17_v17   ;;  %s807_s4 = scalar_lea.vmem %s606_s3, 4096  ;;  %p812_p1 = scmp.lt.s32.totalorder %s606_s3, %s606_s3 }
  0x17   :  { %732 = vmatprep.subr.mxu0 %v239_v21  ;;  %790 = vmatprep.subr.mxu1 %v239_v21  ;;  %p808_p0 = scmp.ne.s32.totalorder %s606_s3, %s807_s4  ;;  %p813_p2 = scmp.lt.s32.totalorder %s807_s4, %s807_s4 }
  0x18   :  { %733 = vmatpush3.msra.mxu0 %v239_v21  ;;  %798 = vmatpush3.msra.mxu1 %v239_v21 }
  0x19   :  { %734 = vmatprep.subr.mxu0 %v238_v22  ;;  %791 = vmatprep.subr.mxu1 %v238_v22  ;;  %p814_p3 = por %p813_p2, %p812_p1 }
  0x1a   :  { %113 = vperm.xlu1 %806, %v34_v19   ;;  %65 = vperm.xlu0 %805, %v18_v20  }
  0x1b   :  { %735 = vmatpush3.msra.mxu0 %v238_v22  ;;  %799 = vmatpush3.msra.mxu1 %v238_v22  ;;  %p815_p4 = pnand %p814_p3, %p808_p0 }
  0x1e   :  { %116 = vperm.xlu1 %806, %v35_v23   ;;  %68 = vperm.xlu0 %805, %v19_v24  }
  0x22   :  { %119 = vperm.xlu1 %806, %v36_v25   ;;  %71 = vperm.xlu0 %805, %v20_v26  }
  0x26   :  { %122 = vperm.xlu1 %806, %v37_v27   ;;  %74 = vperm.xlu0 %805, %v21_v28  }
  0x2a   :  { %125 = vperm.xlu1 %806, %v38_v29   ;;  %77 = vperm.xlu0 %805, %v22_v30  }
  0x2e   :  { %128 = vperm.xlu1 %806, %v39_v31   ;;  %80 = vperm.xlu0 %805, %v23_v32  }
  0x32   :  { %131 = vperm.xlu1 %806, %v40_v33   ;;  %83 = vperm.xlu0 %805, %v24_v34  }
  0x36   :  { %134 = vperm.xlu1 %806, %v41_v35   ;;  %86 = vperm.xlu0 %805, %v25_v36  }
  0x3a   :  { %137 = vperm.xlu1 %806, %v42_v37   ;;  %89 = vperm.xlu0 %805, %v26_v38  }
  0x3e   :  { %140 = vperm.xlu1 %806, %v43_v39   ;;  %92 = vperm.xlu0 %805, %v27_v40  }
  0x7d   :  { %v51_v43 = vpop.permute.xlu1 %50  ;;  %v48_v44 = vpop.permute.xlu0 %47 }
  0x7e   :  { %vm143_vm1 = vcmp.eq.s32.totalorder %v51_v43, %v969_v42  ;;  %vm142_vm2 = vcmp.eq.s32.totalorder %v48_v44, %v969_v42 }
  0x7f   :  { %v617_v46 = vsel %vm143_vm1, 1.0, %v830_v45  ;;  %v616_v47 = vsel %vm142_vm2, 1.0, %v830_v45 }
  0x80   :  { %736 = vmatprep.mubr.msk.f32.mxu0 %vm246_vm0, %v616_v47 }
  0x81   :  { %v99_v48 = vpop.permute.xlu1 %98  ;;  %737 = vmatmul.mubr.msk.f32.vlgmr.msra.gmra.mxu0 %vm246_vm0, %v617_v46  ;;  %v96_v49 = vpop.permute.xlu0 %95 }
  0x82   :  { %vm159_vm3 = vcmp.eq.s32.totalorder %v99_v48, %v969_v42  ;;  %vm158_vm4 = vcmp.eq.s32.totalorder %v96_v49, %v969_v42 }
  0x83   :  { %v633_v50 = vsel %vm159_vm3, 1.0, %v830_v45  ;;  %v632_v51 = vsel %vm158_vm4, 1.0, %v830_v45 }
  0x84   :  { %760 = vmatprep.mubr.msk.f32.mxu1 %vm246_vm0, %v632_v51 }
  0x85   :  { %v102_v52 = vpop.permute.xlu1 %101  ;;  %761 = vmatmul.mubr.msk.f32.vlgmr.msra.gmra.mxu1 %vm246_vm0, %v633_v50  ;;  %v54_v53 = vpop.permute.xlu0 %53 }
  0x86   :  { %vm160_vm5 = vcmp.eq.s32.totalorder %v102_v52, %v969_v42  ;;  %vm144_vm6 = vcmp.eq.s32.totalorder %v54_v53, %v969_v42 }
  0x87   :  { %v634_v54 = vsel %vm160_vm5, 1.0, %v830_v45  ;;  %v618_v55 = vsel %vm144_vm6, 1.0, %v830_v45 }
  0x88   :  { %739 = vmatprep.mubr.msk.f32.mxu0 %vm246_vm0, %v618_v55  ;;  %763 = vmatprep.mubr.msk.f32.mxu1 %vm246_vm0, %v634_v54 }
  0x89   :  { %v105_v56 = vpop.permute.xlu1 %104  ;;  %v57_v57 = vpop.permute.xlu0 %56 }
  0x8a   :  { %vm161_vm7 = vcmp.eq.s32.totalorder %v105_v56, %v969_v42  ;;  %vm145_vm8 = vcmp.eq.s32.totalorder %v57_v57, %v969_v42 }
  0x8b   :  { %v635_v58 = vsel %vm161_vm7, 1.0, %v830_v45  ;;  %v619_v59 = vsel %vm145_vm8, 1.0, %v830_v45 }
  0x8c   :  { %740 = vmatmul.mubr.msk.f32.gmra.mxu0 %vm246_vm0, %v619_v59  ;;  %764 = vmatmul.mubr.msk.f32.gmra.mxu1 %vm246_vm0, %v635_v58 }
  0x8d   :  { %v108_v60 = vpop.permute.xlu1 %107  ;;  %v60_v61 = vpop.permute.xlu0 %59 }
  0x8e   :  { %vm162_vm9 = vcmp.eq.s32.totalorder %v108_v60, %v969_v42  ;;  %vm146_vm10 = vcmp.eq.s32.totalorder %v60_v61, %v969_v42 }
  0x8f   :  { %v636_v62 = vsel %vm162_vm9, 1.0, %v830_v45  ;;  %v620_v63 = vsel %vm146_vm10, 1.0, %v830_v45 }
  0x90   :  { %742 = vmatprep.mubr.msk.f32.mxu0 %vm246_vm0, %v620_v63  ;;  %766 = vmatprep.mubr.msk.f32.mxu1 %vm246_vm0, %v636_v62 }
  0x91   :  { %v111_v0 = vpop.permute.xlu1 %110  ;;  %v63_v1 = vpop.permute.xlu0 %62 }
  0x92   :  { %vm163_vm11 = vcmp.eq.s32.totalorder %v111_v0, %v969_v42  ;;  %vm147_vm12 = vcmp.eq.s32.totalorder %v63_v1, %v969_v42 }
  0x93   :  { %v637_v2 = vsel %vm163_vm11, 1.0, %v830_v45  ;;  %v621_v3 = vsel %vm147_vm12, 1.0, %v830_v45 }
  0x94   :  { %743 = vmatmul.mubr.msk.f32.gmra.mxu0 %vm246_vm0, %v621_v3  ;;  %767 = vmatmul.mubr.msk.f32.gmra.mxu1 %vm246_vm0, %v637_v2 }
  0x95   :  { %v114_v4 = vpop.permute.xlu1 %113  ;;  %v66_v5 = vpop.permute.xlu0 %65 }
  0x96   :  { %vm164_vm13 = vcmp.eq.s32.totalorder %v114_v4, %v969_v42  ;;  %vm148_vm14 = vcmp.eq.s32.totalorder %v66_v5, %v969_v42 }
  0x97   :  { %v638_v6 = vsel %vm164_vm13, 1.0, %v830_v45  ;;  %v622_v7 = vsel %vm148_vm14, 1.0, %v830_v45 }
  0x98   :  { %745 = vmatprep.mubr.msk.f32.mxu0 %vm246_vm0, %v622_v7  ;;  %769 = vmatprep.mubr.msk.f32.mxu1 %vm246_vm0, %v638_v6 }
  0x99   :  { %v117_v8 = vpop.permute.xlu1 %116  ;;  %v69_v9 = vpop.permute.xlu0 %68 }
  0x9a   :  { %vm165_vm15 = vcmp.eq.s32.totalorder %v117_v8, %v969_v42  ;;  %vm149_vm1 = vcmp.eq.s32.totalorder %v69_v9, %v969_v42 }
  0x9b   :  { %v639_v10 = vsel %vm165_vm15, 1.0, %v830_v45  ;;  %v623_v11 = vsel %vm149_vm1, 1.0, %v830_v45 }
  0x9c   :  { %746 = vmatmul.mubr.msk.f32.gmra.mxu0 %vm246_vm0, %v623_v11  ;;  %770 = vmatmul.mubr.msk.f32.gmra.mxu1 %vm246_vm0, %v639_v10 }
  0x9d   :  { %v120_v12 = vpop.permute.xlu1 %119  ;;  %v72_v13 = vpop.permute.xlu0 %71 }
  0x9e   :  { %vm166_vm2 = vcmp.eq.s32.totalorder %v120_v12, %v969_v42  ;;  %vm150_vm3 = vcmp.eq.s32.totalorder %v72_v13, %v969_v42 }
  0x9f   :  { %v640_v14 = vsel %vm166_vm2, 1.0, %v830_v45  ;;  %v624_v15 = vsel %vm150_vm3, 1.0, %v830_v45 }
  0xa0   :  { %748 = vmatprep.mubr.msk.f32.mxu0 %vm246_vm0, %v624_v15  ;;  %772 = vmatprep.mubr.msk.f32.mxu1 %vm246_vm0, %v640_v14 }
  0xa1   :  { %v123_v16 = vpop.permute.xlu1 %122  ;;  %v75_v17 = vpop.permute.xlu0 %74 }
  0xa2   :  { %vm167_vm4 = vcmp.eq.s32.totalorder %v123_v16, %v969_v42  ;;  %vm151_vm5 = vcmp.eq.s32.totalorder %v75_v17, %v969_v42 }
  0xa3   :  { %v641_v18 = vsel %vm167_vm4, 1.0, %v830_v45  ;;  %v625_v19 = vsel %vm151_vm5, 1.0, %v830_v45 }
  0xa4   :  { %749 = vmatmul.mubr.msk.f32.gmra.mxu0 %vm246_vm0, %v625_v19  ;;  %773 = vmatmul.mubr.msk.f32.gmra.mxu1 %vm246_vm0, %v641_v18 }
  0xa5   :  { %v126_v20 = vpop.permute.xlu1 %125  ;;  %v78_v21 = vpop.permute.xlu0 %77 }
  0xa6   :  { %vm168_vm6 = vcmp.eq.s32.totalorder %v126_v20, %v969_v42  ;;  %vm152_vm7 = vcmp.eq.s32.totalorder %v78_v21, %v969_v42 }
  0xa7   :  { %v642_v22 = vsel %vm168_vm6, 1.0, %v830_v45  ;;  %v626_v23 = vsel %vm152_vm7, 1.0, %v830_v45 }
  0xa8   :  { %751 = vmatprep.mubr.msk.f32.mxu0 %vm246_vm0, %v626_v23  ;;  %775 = vmatprep.mubr.msk.f32.mxu1 %vm246_vm0, %v642_v22 }
  0xa9   :  { %v129_v24 = vpop.permute.xlu1 %128  ;;  %v81_v25 = vpop.permute.xlu0 %80 }
  0xaa   :  { %vm169_vm8 = vcmp.eq.s32.totalorder %v129_v24, %v969_v42  ;;  %vm153_vm9 = vcmp.eq.s32.totalorder %v81_v25, %v969_v42 }
  0xab   :  { %v643_v26 = vsel %vm169_vm8, 1.0, %v830_v45  ;;  %v627_v27 = vsel %vm153_vm9, 1.0, %v830_v45 }
  0xac   :  { %752 = vmatmul.mubr.msk.f32.gmra.mxu0 %vm246_vm0, %v627_v27  ;;  %776 = vmatmul.mubr.msk.f32.gmra.mxu1 %vm246_vm0, %v643_v26 }
  0xad   :  { %v132_v28 = vpop.permute.xlu1 %131  ;;  %v84_v29 = vpop.permute.xlu0 %83 }
  0xae   :  { %vm170_vm10 = vcmp.eq.s32.totalorder %v132_v28, %v969_v42  ;;  %vm154_vm11 = vcmp.eq.s32.totalorder %v84_v29, %v969_v42 }
  0xaf   :  { %v644_v30 = vsel %vm170_vm10, 1.0, %v830_v45  ;;  %v628_v31 = vsel %vm154_vm11, 1.0, %v830_v45 }
  0xb0   :  { %754 = vmatprep.mubr.msk.f32.mxu0 %vm246_vm0, %v628_v31  ;;  %778 = vmatprep.mubr.msk.f32.mxu1 %vm246_vm0, %v644_v30 }
  0xb1   :  { %v135_v32 = vpop.permute.xlu1 %134  ;;  %v87_v33 = vpop.permute.xlu0 %86 }
  0xb2   :  { %vm171_vm12 = vcmp.eq.s32.totalorder %v135_v32, %v969_v42  ;;  %vm155_vm13 = vcmp.eq.s32.totalorder %v87_v33, %v969_v42 }
  0xb3   :  { %v645_v34 = vsel %vm171_vm12, 1.0, %v830_v45  ;;  %v629_v35 = vsel %vm155_vm13, 1.0, %v830_v45 }
  0xb4   :  { %755 = vmatmul.mubr.msk.f32.gmra.mxu0 %vm246_vm0, %v629_v35  ;;  %779 = vmatmul.mubr.msk.f32.gmra.mxu1 %vm246_vm0, %v645_v34 }
  0xb5   :  { %v138_v36 = vpop.permute.xlu1 %137  ;;  %v90_v37 = vpop.permute.xlu0 %89 }
  0xb6   :  { %vm172_vm14 = vcmp.eq.s32.totalorder %v138_v36, %v969_v42  ;;  %vm156_vm15 = vcmp.eq.s32.totalorder %v90_v37, %v969_v42 }
  0xb7   :  { %v646_v38 = vsel %vm172_vm14, 1.0, %v830_v45  ;;  %v630_v39 = vsel %vm156_vm15, 1.0, %v830_v45 }
  0xb8   :  { %757 = vmatprep.mubr.msk.f32.mxu0 %vm246_vm0, %v630_v39  ;;  %781 = vmatprep.mubr.msk.f32.mxu1 %vm246_vm0, %v646_v38 }
  0xb9   :  { %v141_v40 = vpop.permute.xlu1 %140  ;;  %v93_v41 = vpop.permute.xlu0 %92 }
  0xba   :  { %vm173_vm1 = vcmp.eq.s32.totalorder %v141_v40, %v969_v42  ;;  %vm157_vm2 = vcmp.eq.s32.totalorder %v93_v41, %v969_v42 }
  0xbb   :  { %v647_v43 = vsel %vm173_vm1, 1.0, %v830_v45  ;;  %v631_v44 = vsel %vm157_vm2, 1.0, %v830_v45 }
  0xbc   :  { %758 = vmatmul.mubr.msk.f32.gmra.mxu0 %vm246_vm0, %v631_v44  ;;  %782 = vmatmul.mubr.msk.f32.gmra.mxu1 %vm246_vm0, %v647_v43 }
 0x141   :  { %v738_v46 = vpop.f32.mrf.mxu0 }
 0x142   :  { %569 = vst [vmem:[#allocation2 + $0x8] sm:$0xff] %v738_v46 }
 0x143   :  { %v409_v47 = vpop.f32.mrf.mxu0 }
 0x144   :  { %568 = vst [vmem:[#allocation2] sm:$0xff] %v409_v47 }
 0x145   :  { %v762_v48 = vpop.f32.mrf.mxu1 }
 0x146   :  { %585 = vst [vmem:[#allocation2 + $0x88] sm:$0xff] %v762_v48 }
 0x147   :  { %v489_v49 = vpop.f32.mrf.mxu1 }
 0x148   :  { %584 = vst [vmem:[#allocation2 + $0x80] sm:$0xff] %v489_v49 }
 0x14c   :  { %v741_v50 = vpop.f32.mrf.mxu0  ;;  %v765_v51 = vpop.f32.mrf.mxu1 }
 0x14d   :  { %571 = vst [vmem:[#allocation2 + $0x18] sm:$0xff] %v741_v50  ;;  %587 = vst [vmem:[#allocation2 + $0x98] sm:$0xff] %v765_v51 }
 0x14e   :  { %v419_v42 = vpop.f32.mrf.mxu0  ;;  %v499_v52 = vpop.f32.mrf.mxu1 }
 0x14f   :  { %570 = vst [vmem:[#allocation2 + $0x10] sm:$0xff] %v419_v42  ;;  %586 = vst [vmem:[#allocation2 + $0x90] sm:$0xff] %v499_v52 }
 0x154   :  { %v744_v45 = vpop.f32.mrf.mxu0  ;;  %v768_v53 = vpop.f32.mrf.mxu1 }
 0x155   :  { %573 = vst [vmem:[#allocation2 + $0x28] sm:$0xff] %v744_v45  ;;  %589 = vst [vmem:[#allocation2 + $0xa8] sm:$0xff] %v768_v53 }
 0x156   :  { %v429_v54 = vpop.f32.mrf.mxu0  ;;  %v509_v55 = vpop.f32.mrf.mxu1 }
 0x157   :  { %572 = vst [vmem:[#allocation2 + $0x20] sm:$0xff] %v429_v54  ;;  %588 = vst [vmem:[#allocation2 + $0xa0] sm:$0xff] %v509_v55 }
 0x15c   :  { %v747_v56 = vpop.f32.mrf.mxu0  ;;  %v771_v57 = vpop.f32.mrf.mxu1 }
 0x15d   :  { %575 = vst [vmem:[#allocation2 + $0x38] sm:$0xff] %v747_v56  ;;  %591 = vst [vmem:[#allocation2 + $0xb8] sm:$0xff] %v771_v57 }
 0x15e   :  { %v439_v58 = vpop.f32.mrf.mxu0  ;;  %v519_v59 = vpop.f32.mrf.mxu1 }
 0x15f   :  { %574 = vst [vmem:[#allocation2 + $0x30] sm:$0xff] %v439_v58  ;;  %590 = vst [vmem:[#allocation2 + $0xb0] sm:$0xff] %v519_v59 }
 0x164   :  { %v750_v60 = vpop.f32.mrf.mxu0  ;;  %v774_v61 = vpop.f32.mrf.mxu1 }
 0x165   :  { %577 = vst [vmem:[#allocation2 + $0x48] sm:$0xff] %v750_v60  ;;  %593 = vst [vmem:[#allocation2 + $0xc8] sm:$0xff] %v774_v61 }
 0x166   :  { %v449_v62 = vpop.f32.mrf.mxu0  ;;  %v529_v63 = vpop.f32.mrf.mxu1 }
 0x167   :  { %576 = vst [vmem:[#allocation2 + $0x40] sm:$0xff] %v449_v62  ;;  %592 = vst [vmem:[#allocation2 + $0xc0] sm:$0xff] %v529_v63 }
 0x16c   :  { %v753_v0 = vpop.f32.mrf.mxu0  ;;  %v777_v1 = vpop.f32.mrf.mxu1 }
 0x16d   :  { %579 = vst [vmem:[#allocation2 + $0x58] sm:$0xff] %v753_v0  ;;  %595 = vst [vmem:[#allocation2 + $0xd8] sm:$0xff] %v777_v1 }
 0x16e   :  { %v459_v2 = vpop.f32.mrf.mxu0  ;;  %v539_v3 = vpop.f32.mrf.mxu1 }
 0x16f   :  { %578 = vst [vmem:[#allocation2 + $0x50] sm:$0xff] %v459_v2  ;;  %594 = vst [vmem:[#allocation2 + $0xd0] sm:$0xff] %v539_v3 }
 0x174   :  { %v756_v4 = vpop.f32.mrf.mxu0  ;;  %v780_v5 = vpop.f32.mrf.mxu1 }
 0x175   :  { %581 = vst [vmem:[#allocation2 + $0x68] sm:$0xff] %v756_v4  ;;  %597 = vst [vmem:[#allocation2 + $0xe8] sm:$0xff] %v780_v5 }
 0x176   :  { %v469_v6 = vpop.f32.mrf.mxu0  ;;  %v549_v7 = vpop.f32.mrf.mxu1 }
 0x177   :  { %580 = vst [vmem:[#allocation2 + $0x60] sm:$0xff] %v469_v6  ;;  %596 = vst [vmem:[#allocation2 + $0xe0] sm:$0xff] %v549_v7 }
 0x17c   :  { %v759_v8 = vpop.f32.mrf.mxu0  ;;  %v783_v9 = vpop.f32.mrf.mxu1 }
 0x17d   :  { %583 = vst [vmem:[#allocation2 + $0x78] sm:$0xff] %v759_v8  ;;  %599 = vst [vmem:[#allocation2 + $0xf8] sm:$0xff] %v783_v9 }
 0x17e   :  { %v479_v10 = vpop.f32.mrf.mxu0  ;;  %v559_v11 = vpop.f32.mrf.mxu1 }
 0x17f   :  { %582 = vst [vmem:[#allocation2 + $0x70] sm:$0xff] %v479_v10  ;;  %598 = vst [vmem:[#allocation2 + $0xf0] sm:$0xff] %v559_v11 }
 0x180   :  { %818 = shalt.err (!%p815_p4)
}
 0x181   :  { %s832_s5 = smov 128   ;;  %s833_s6 = smov 8  }
 0x182   :  { %611 = dma.vmem_to_hbm [thread:$0]  %s606_s3, 4096, %s1072_s2, [#allocation3], %s832_s5, %s832_s5, %s833_s6  }
 0x183   :  { %827 = dma.done.wait [#allocation3], 4096  }
 0x184   :  { %828 = vsyncadd [#allocation3], 4294963200 }
 0x185   :  { %615 = vsyncpa [#allocation3], 1 }

</bundles_post_ra>
